<compile_context>
chip_gen: v7x
topology: tpu7x:2x2x1
jax: 0.10.0
libtpu: 0.0.40
codegen_flags: <defaults>
</compile_context>

<pallas_src>
import jax
import jax.numpy as jnp
from jax.experimental import pallas as pl
from jax.experimental.pallas import tpu as pltpu

INPUT_SIZE = 16
REDUCED_SIZE = 10   # must equal HIDDEN_SIZE (see initHidden in the module)
HIDDEN_SIZE = 10    # must be 10 (linear2 = nn.Linear(10, output_size))
OUTPUT_SIZE = 4
BATCH = 8           # small stand-in for BATCH_SIZE = 50
SEQ = 6
LAYER = 1

HP = 16                        # hidden padded to 2 sublane granules (per-gate row block)
G4 = 4 * HP                    # 64 packed gate rows, order [i | f | g | o]
OP = 8                         # linear2 output rows padded to the sublane granule
PCOLS = max(INPUT_SIZE, HP)    # packed parameter buffer lane width (16)


def lstm_kernel(x_ref, p_ref, hc_ref, out_ref):
    """Whole sequence in one invocation; recurrence in transposed layout.

    x_ref:   (T, I, B)   inputs, transposed so batch sits on the lane axis
    p_ref:   (208, 16)   packed parameters (static row blocks, see _pack_params)
    hc_ref:  (2, HP, B)  [h0; c0], transposed and zero-padded to HP rows
    out_ref: (OP, B)     transposed linear2 output (rows >= OUTPUT_SIZE are zero)
    """
    T, I, B = x_ref.shape

    # Static row-block slices of the single packed parameter buffer (one DMA).
    wxg = p_ref[0:G4, :I]                          # (64, I)  x->gates (pca folded, 0.5-prescaled)
    whh = p_ref[G4:2 * G4, :HP]                    # (64, HP) h->gates (0.5-prescaled)
    bxg = p_ref[2 * G4:3 * G4, 0:1]                # (64, 1)  folded gate bias (prescaled)
    w2 = p_ref[3 * G4:3 * G4 + OP, :HP]            # (8, HP)  linear2 weight, transposed
    b2 = p_ref[3 * G4 + OP:3 * G4 + 2 * OP, 0:1]   # (8, 1)   linear2 bias

    bxg_b = jnp.broadcast_to(bxg, (G4, B))         # hoisted loop-invariant broadcast

    h = hc_ref[0]                                  # (HP, B)
    c = hc_ref[1]                                  # (HP, B)

    # Fully unrolled recurrence (T is small). gx is independent of (h, c), so the
    # scheduler pulls it off the serial critical path; per step only the single
    # MXU tile whh @ h, one gates-tanh, one cell-tanh and aligned VPU math remain.
    # TODO(synk): for T >~ 32 switch to lax.fori_loop(..., unroll=k) carrying (h, c).
    for t in range(T):
        gx = jnp.dot(wxg, x_ref[t], preferred_element_type=jnp.float32) + bxg_b
        gates = gx + jnp.dot(whh, h, preferred_element_type=jnp.float32)   # (64, B)
        y = jnp.tanh(gates)                        # one EUP pass over all 4 gates
        # sigmoid(z) == 0.5 + 0.5*tanh(z/2); the /2 is folded into the weights,
        # so i/f/o come out of the same tanh as g. Slices are sublane-aligned (x16).
        i_g = 0.5 + 0.5 * y[0 * HP:1 * HP, :]
        f_g = 0.5 + 0.5 * y[1 * HP:2 * HP, :]
        g_g = y[2 * HP:3 * HP, :]
        o_g = 0.5 + 0.5 * y[3 * HP:4 * HP, :]
        c = f_g * c + i_g * g_g
        h = o_g * jnp.tanh(c)

    # out[:, -1, :] -> dropout(dropout(.)) == identity (eval) -> linear2
    out = (jnp.dot(w2, h, preferred_element_type=jnp.float32)
           + jnp.broadcast_to(b2, (OP, B)))
    out_ref[...] = out.astype(out_ref.dtype)


def _pack_params(params):
    """Fold pca_linear into the gate projection and pack all weights/biases into
    one (3*G4 + 2*OP, PCOLS) f32 buffer == a single HBM->VMEM DMA.

    Row layout (all zero-padded blocks, gate order [i | f | g | o]):
      [  0,  64)  W_xg^T  gate-padded, rows pre-scaled (0.5 for i/f/o, 1 for g)
      [ 64, 128)  W_hh^T  gate-padded, same pre-scale
      [128, 192)  col 0 = folded gate bias (bp@W_ih + b_ih + b_hh), pre-scaled
      [192, 200)  W_2^T   (linear2), zero-padded to (OP, HP)
      [200, 208)  col 0 = b_2
    """
    wp_T, bp, wih_p, whh_p, bg, w2_T, b2 = params
    H = whh_p.shape[0]
    O = w2_T.shape[1]

    # pca_linear folded into the input->gate projection (exact up to f32 reassoc).
    w_xg = wp_T @ wih_p                  # (I, 4H)
    b_xg = bp @ wih_p + bg               # (1, 4H)

    def gate_pad_t(w):                   # (K, 4H) -> (G4, K): gate-major padded rows
        k = w.shape[0]
        wt = w.T.reshape(4, H, k)
        wt = jnp.pad(wt, ((0, 0), (0, HP - H), (0, 0)))
        return wt.reshape(G4, k)

    # 0.5 pre-scale on sigmoid gates (i, f, o): sigmoid(z) = 0.5 + 0.5*tanh(z/2).
    # Scaling by a power of two is exact in f32, so this changes nothing numerically.
    m_col = jnp.concatenate([jnp.full((2 * HP, 1), 0.5, jnp.float32),
                             jnp.ones((HP, 1), jnp.float32),
                             jnp.full((HP, 1), 0.5, jnp.float32)], axis=0)

    wxg_t = gate_pad_t(w_xg) * m_col                                    # (64, I)
    whh_t = gate_pad_t(jnp.pad(whh_p, ((0, HP - H), (0, 0)))) * m_col   # (64, HP)
    bxg_t = gate_pad_t(b_xg) * m_col                                    # (64, 1)

    def to_block(a, rows):               # zero-pad to (rows, PCOLS)
        return jnp.pad(a, ((0, rows - a.shape[0]), (0, PCOLS - a.shape[1])))

    w2_blk = jnp.zeros((OP, HP), jnp.float32).at[:O, :H].set(w2_T.T)    # (8, HP)
    b2_col = jnp.zeros((OP, 1), jnp.float32).at[:O, :].set(b2.T)        # (8, 1)

    return jnp.concatenate([to_block(wxg_t, G4),
                            to_block(whh_t, G4),
                            to_block(bxg_t, G4),
                            to_block(w2_blk, OP),
                            to_block(b2_col, OP)], axis=0).astype(jnp.float32)


def lstm_model(x, params, h0, c0):
    """Forward of the PyTorch module (eval mode) for batch-first x: (B, T, I)."""
    B, T, I = x.shape
    H = h0.shape[-1]
    O = params[-2].shape[1]              # w2_T: (H, O)

    pbuf = _pack_params(params)                                   # (208, 16) — 1 DMA
    x_t = jnp.transpose(x, (1, 2, 0))                             # (T, I, B): batch -> lanes
    hc0 = jnp.stack([jnp.pad(h0.T, ((0, HP - H), (0, 0))),
                     jnp.pad(c0.T, ((0, HP - H), (0, 0)))])       # (2, HP, B) — 1 DMA

    vmem = pl.BlockSpec(memory_space=pltpu.MemorySpace.VMEM)
    out_t = pl.pallas_call(
        lstm_kernel,
        out_shape=jax.ShapeDtypeStruct((OP, B), jnp.float32),
        in_specs=[vmem, vmem, vmem],
        out_specs=vmem,
        compiler_params=pltpu.CompilerParams(
            vmem_limit_bytes=2 * 1024 * 1024),
    )(x_t, pbuf, hc0)
    return out_t[:O, :].T                                         # (B, O)


def init_params(key):
    ks = jax.random.split(key, 8)
    scale = 0.1
    wp_T = scale * jax.random.normal(ks[0], (INPUT_SIZE, REDUCED_SIZE), jnp.float32)
    bp = scale * jax.random.normal(ks[1], (1, REDUCED_SIZE), jnp.float32)
    # LSTM weights pre-packed [i | f | g | o] along the output axis.
    wih_p = scale * jax.random.normal(ks[2], (REDUCED_SIZE, 4 * HIDDEN_SIZE), jnp.float32)
    whh_p = scale * jax.random.normal(ks[3], (HIDDEN_SIZE, 4 * HIDDEN_SIZE), jnp.float32)
    # PyTorch LSTM adds bias_ih + bias_hh; fold into one packed bias.
    bg = scale * jax.random.normal(ks[4], (1, 4 * HIDDEN_SIZE), jnp.float32)
    w2_T = scale * jax.random.normal(ks[5], (HIDDEN_SIZE, OUTPUT_SIZE), jnp.float32)
    b2 = scale * jax.random.normal(ks[6], (1, OUTPUT_SIZE), jnp.float32)
    return (wp_T, bp, wih_p, whh_p, bg, w2_T, b2), ks[7]


def reference(x, params, h0, c0):
    """Pure-JAX reference of the PyTorch forward (eval mode)."""
    wp_T, bp, wih_p, whh_p, bg, w2_T, b2 = params
    H = h0.shape[-1]
    xr = x @ wp_T + bp                                  # (B, T, R)
    h, c = h0, c0
    for t in range(x.shape[1]):
        z = xr[:, t, :] @ wih_p + h @ whh_p + bg        # (B, 4H), order i,f,g,o
        i_g = jax.nn.sigmoid(z[:, 0 * H:1 * H])
        f_g = jax.nn.sigmoid(z[:, 1 * H:2 * H])
        g_g = jnp.tanh(z[:, 2 * H:3 * H])
        o_g = jax.nn.sigmoid(z[:, 3 * H:4 * H])
        c = f_g * c + i_g * g_g
        h = o_g * jnp.tanh(c)
    # dropout(dropout(h)) -> identity in eval mode
    return h @ w2_T + b2


if __name__ == "__main__":
    key = jax.random.PRNGKey(0)
    params, key = init_params(key)
    k_x, k_h, k_c = jax.random.split(key, 3)
    x = jax.random.normal(k_x, (BATCH, SEQ, INPUT_SIZE), jnp.float32)
    # initHidden(): torch.randn(LAYER, B, reduced_size), torch.randn(LAYER, B, hidden_size)
    h0 = jax.random.normal(k_h, (BATCH, REDUCED_SIZE), jnp.float32)   # LAYER=1 squeezed
    c0 = jax.random.normal(k_c, (BATCH, HIDDEN_SIZE), jnp.float32)

    out = lstm_model(x, params, h0, c0)
    out = jax.block_until_ready(out)

    ref = reference(x, params, h0, c0)
    assert out.shape == (BATCH, OUTPUT_SIZE)
    assert jnp.allclose(out, ref, atol=1e-5, rtol=1e-5), (
        f"mismatch: max err {jnp.max(jnp.abs(out - ref))}")
    print("KERNEL_OK")
</pallas_src>

<mosaic_0001>
module attributes {stable_mosaic.version = 11 : i64} {
  func.func @lstm_kernel(%arg0: memref<6x16x8xf32, #tpu.memory_space<vmem>>, %arg1: memref<208x16xf32, #tpu.memory_space<vmem>>, %arg2: memref<2x16x8xf32, #tpu.memory_space<vmem>>, %arg3: memref<8x8xf32, #tpu.memory_space<vmem>>) attributes {dimension_semantics = [], scalar_prefetch = 0 : i64, scratch_operands = 0 : i64, tpu.core_type = #tpu.core_type<tc>} {
    %c0 = arith.constant 0 : index
    %c0_0 = arith.constant 0 : index
    %0 = vector.load %arg1[%c0, %c0_0] : memref<208x16xf32, #tpu.memory_space<vmem>>, vector<64x16xf32>
    %c64 = arith.constant 64 : index
    %c0_1 = arith.constant 0 : index
    %1 = vector.load %arg1[%c64, %c0_1] : memref<208x16xf32, #tpu.memory_space<vmem>>, vector<64x16xf32>
    %c128 = arith.constant 128 : index
    %c0_2 = arith.constant 0 : index
    %2 = vector.load %arg1[%c128, %c0_2] : memref<208x16xf32, #tpu.memory_space<vmem>>, vector<64x1xf32>
    %c192 = arith.constant 192 : index
    %c0_3 = arith.constant 0 : index
    %3 = vector.load %arg1[%c192, %c0_3] : memref<208x16xf32, #tpu.memory_space<vmem>>, vector<8x16xf32>
    %c200 = arith.constant 200 : index
    %c0_4 = arith.constant 0 : index
    %4 = vector.load %arg1[%c200, %c0_4] : memref<208x16xf32, #tpu.memory_space<vmem>>, vector<8x1xf32>
    %5 = vector.shape_cast %2 : vector<64x1xf32> to vector<64x1xf32>
    %6 = vector.broadcast %5 : vector<64x1xf32> to vector<64x8xf32>
    %c0_5 = arith.constant 0 : index
    %c0_6 = arith.constant 0 : index
    %c0_7 = arith.constant 0 : index
    %7 = vector.load %arg2[%c0_5, %c0_6, %c0_7] : memref<2x16x8xf32, #tpu.memory_space<vmem>>, vector<1x16x8xf32>
    %8 = vector.shape_cast %7 : vector<1x16x8xf32> to vector<16x8xf32>
    %c1 = arith.constant 1 : index
    %c0_8 = arith.constant 0 : index
    %c0_9 = arith.constant 0 : index
    %9 = vector.load %arg2[%c1, %c0_8, %c0_9] : memref<2x16x8xf32, #tpu.memory_space<vmem>>, vector<1x16x8xf32>
    %10 = vector.shape_cast %9 : vector<1x16x8xf32> to vector<16x8xf32>
    %c0_10 = arith.constant 0 : index
    %c0_11 = arith.constant 0 : index
    %c0_12 = arith.constant 0 : index
    %11 = vector.load %arg0[%c0_10, %c0_11, %c0_12] : memref<6x16x8xf32, #tpu.memory_space<vmem>>, vector<1x16x8xf32>
    %12 = vector.shape_cast %11 : vector<1x16x8xf32> to vector<16x8xf32>
    %cst = arith.constant dense<0.000000e+00> : vector<64x8xf32>
    %13 = tpu.matmul %0, %12, %cst {dimension_numbers = #tpu.dot_dimension_numbers<[1], [0], [0], [1], [0, 0, 1, 1], [], []>} : vector<64x16xf32>, vector<16x8xf32>, vector<64x8xf32> -> vector<64x8xf32>
    %14 = arith.addf %13, %6 : vector<64x8xf32>
    %cst_13 = arith.constant dense<0.000000e+00> : vector<64x8xf32>
    %15 = tpu.matmul %1, %8, %cst_13 {dimension_numbers = #tpu.dot_dimension_numbers<[1], [0], [0], [1], [0, 0, 1, 1], [], []>} : vector<64x16xf32>, vector<16x8xf32>, vector<64x8xf32> -> vector<64x8xf32>
    %16 = arith.addf %14, %15 : vector<64x8xf32>
    %17 = math.tanh %16 : vector<64x8xf32>
    %18 = vector.extract_strided_slice %17 {offsets = [0, 0], sizes = [16, 8], strides = [1, 1]} : vector<64x8xf32> to vector<16x8xf32>
    %cst_14 = arith.constant 5.000000e-01 : f32
    %19 = vector.broadcast %cst_14 : f32 to vector<16x8xf32>
    %20 = arith.mulf %19, %18 : vector<16x8xf32>
    %cst_15 = arith.constant 5.000000e-01 : f32
    %21 = vector.broadcast %cst_15 : f32 to vector<16x8xf32>
    %22 = arith.addf %21, %20 : vector<16x8xf32>
    %23 = vector.extract_strided_slice %17 {offsets = [16, 0], sizes = [16, 8], strides = [1, 1]} : vector<64x8xf32> to vector<16x8xf32>
    %cst_16 = arith.constant 5.000000e-01 : f32
    %24 = vector.broadcast %cst_16 : f32 to vector<16x8xf32>
    %25 = arith.mulf %24, %23 : vector<16x8xf32>
    %cst_17 = arith.constant 5.000000e-01 : f32
    %26 = vector.broadcast %cst_17 : f32 to vector<16x8xf32>
    %27 = arith.addf %26, %25 : vector<16x8xf32>
    %28 = vector.extract_strided_slice %17 {offsets = [32, 0], sizes = [16, 8], strides = [1, 1]} : vector<64x8xf32> to vector<16x8xf32>
    %29 = vector.extract_strided_slice %17 {offsets = [48, 0], sizes = [16, 8], strides = [1, 1]} : vector<64x8xf32> to vector<16x8xf32>
    %cst_18 = arith.constant 5.000000e-01 : f32
    %30 = vector.broadcast %cst_18 : f32 to vector<16x8xf32>
    %31 = arith.mulf %30, %29 : vector<16x8xf32>
    %cst_19 = arith.constant 5.000000e-01 : f32
    %32 = vector.broadcast %cst_19 : f32 to vector<16x8xf32>
    %33 = arith.addf %32, %31 : vector<16x8xf32>
    %34 = arith.mulf %27, %10 : vector<16x8xf32>
    %35 = arith.mulf %22, %28 : vector<16x8xf32>
    %36 = arith.addf %34, %35 : vector<16x8xf32>
    %37 = math.tanh %36 : vector<16x8xf32>
    %38 = arith.mulf %33, %37 : vector<16x8xf32>
    %c1_20 = arith.constant 1 : index
    %c0_21 = arith.constant 0 : index
    %c0_22 = arith.constant 0 : index
    %39 = vector.load %arg0[%c1_20, %c0_21, %c0_22] : memref<6x16x8xf32, #tpu.memory_space<vmem>>, vector<1x16x8xf32>
    %40 = vector.shape_cast %39 : vector<1x16x8xf32> to vector<16x8xf32>
    %cst_23 = arith.constant dense<0.000000e+00> : vector<64x8xf32>
    %41 = tpu.matmul %0, %40, %cst_23 {dimension_numbers = #tpu.dot_dimension_numbers<[1], [0], [0], [1], [0, 0, 1, 1], [], []>} : vector<64x16xf32>, vector<16x8xf32>, vector<64x8xf32> -> vector<64x8xf32>
    %42 = arith.addf %41, %6 : vector<64x8xf32>
    %cst_24 = arith.constant dense<0.000000e+00> : vector<64x8xf32>
    %43 = tpu.matmul %1, %38, %cst_24 {dimension_numbers = #tpu.dot_dimension_numbers<[1], [0], [0], [1], [0, 0, 1, 1], [], []>} : vector<64x16xf32>, vector<16x8xf32>, vector<64x8xf32> -> vector<64x8xf32>
    %44 = arith.addf %42, %43 : vector<64x8xf32>
    %45 = math.tanh %44 : vector<64x8xf32>
    %46 = vector.extract_strided_slice %45 {offsets = [0, 0], sizes = [16, 8], strides = [1, 1]} : vector<64x8xf32> to vector<16x8xf32>
    %cst_25 = arith.constant 5.000000e-01 : f32
    %47 = vector.broadcast %cst_25 : f32 to vector<16x8xf32>
    %48 = arith.mulf %47, %46 : vector<16x8xf32>
    %cst_26 = arith.constant 5.000000e-01 : f32
    %49 = vector.broadcast %cst_26 : f32 to vector<16x8xf32>
    %50 = arith.addf %49, %48 : vector<16x8xf32>
    %51 = vector.extract_strided_slice %45 {offsets = [16, 0], sizes = [16, 8], strides = [1, 1]} : vector<64x8xf32> to vector<16x8xf32>
    %cst_27 = arith.constant 5.000000e-01 : f32
    %52 = vector.broadcast %cst_27 : f32 to vector<16x8xf32>
    %53 = arith.mulf %52, %51 : vector<16x8xf32>
    %cst_28 = arith.constant 5.000000e-01 : f32
    %54 = vector.broadcast %cst_28 : f32 to vector<16x8xf32>
    %55 = arith.addf %54, %53 : vector<16x8xf32>
    %56 = vector.extract_strided_slice %45 {offsets = [32, 0], sizes = [16, 8], strides = [1, 1]} : vector<64x8xf32> to vector<16x8xf32>
    %57 = vector.extract_strided_slice %45 {offsets = [48, 0], sizes = [16, 8], strides = [1, 1]} : vector<64x8xf32> to vector<16x8xf32>
    %cst_29 = arith.constant 5.000000e-01 : f32
    %58 = vector.broadcast %cst_29 : f32 to vector<16x8xf32>
    %59 = arith.mulf %58, %57 : vector<16x8xf32>
    %cst_30 = arith.constant 5.000000e-01 : f32
    %60 = vector.broadcast %cst_30 : f32 to vector<16x8xf32>
    %61 = arith.addf %60, %59 : vector<16x8xf32>
    %62 = arith.mulf %55, %36 : vector<16x8xf32>
    %63 = arith.mulf %50, %56 : vector<16x8xf32>
    %64 = arith.addf %62, %63 : vector<16x8xf32>
    %65 = math.tanh %64 : vector<16x8xf32>
    %66 = arith.mulf %61, %65 : vector<16x8xf32>
    %c2 = arith.constant 2 : index
    %c0_31 = arith.constant 0 : index
    %c0_32 = arith.constant 0 : index
    %67 = vector.load %arg0[%c2, %c0_31, %c0_32] : memref<6x16x8xf32, #tpu.memory_space<vmem>>, vector<1x16x8xf32>
    %68 = vector.shape_cast %67 : vector<1x16x8xf32> to vector<16x8xf32>
    %cst_33 = arith.constant dense<0.000000e+00> : vector<64x8xf32>
    %69 = tpu.matmul %0, %68, %cst_33 {dimension_numbers = #tpu.dot_dimension_numbers<[1], [0], [0], [1], [0, 0, 1, 1], [], []>} : vector<64x16xf32>, vector<16x8xf32>, vector<64x8xf32> -> vector<64x8xf32>
    %70 = arith.addf %69, %6 : vector<64x8xf32>
    %cst_34 = arith.constant dense<0.000000e+00> : vector<64x8xf32>
    %71 = tpu.matmul %1, %66, %cst_34 {dimension_numbers = #tpu.dot_dimension_numbers<[1], [0], [0], [1], [0, 0, 1, 1], [], []>} : vector<64x16xf32>, vector<16x8xf32>, vector<64x8xf32> -> vector<64x8xf32>
    %72 = arith.addf %70, %71 : vector<64x8xf32>
    %73 = math.tanh %72 : vector<64x8xf32>
    %74 = vector.extract_strided_slice %73 {offsets = [0, 0], sizes = [16, 8], strides = [1, 1]} : vector<64x8xf32> to vector<16x8xf32>
    %cst_35 = arith.constant 5.000000e-01 : f32
    %75 = vector.broadcast %cst_35 : f32 to vector<16x8xf32>
    %76 = arith.mulf %75, %74 : vector<16x8xf32>
    %cst_36 = arith.constant 5.000000e-01 : f32
    %77 = vector.broadcast %cst_36 : f32 to vector<16x8xf32>
    %78 = arith.addf %77, %76 : vector<16x8xf32>
    %79 = vector.extract_strided_slice %73 {offsets = [16, 0], sizes = [16, 8], strides = [1, 1]} : vector<64x8xf32> to vector<16x8xf32>
    %cst_37 = arith.constant 5.000000e-01 : f32
    %80 = vector.broadcast %cst_37 : f32 to vector<16x8xf32>
    %81 = arith.mulf %80, %79 : vector<16x8xf32>
    %cst_38 = arith.constant 5.000000e-01 : f32
    %82 = vector.broadcast %cst_38 : f32 to vector<16x8xf32>
    %83 = arith.addf %82, %81 : vector<16x8xf32>
    %84 = vector.extract_strided_slice %73 {offsets = [32, 0], sizes = [16, 8], strides = [1, 1]} : vector<64x8xf32> to vector<16x8xf32>
    %85 = vector.extract_strided_slice %73 {offsets = [48, 0], sizes = [16, 8], strides = [1, 1]} : vector<64x8xf32> to vector<16x8xf32>
    %cst_39 = arith.constant 5.000000e-01 : f32
    %86 = vector.broadcast %cst_39 : f32 to vector<16x8xf32>
    %87 = arith.mulf %86, %85 : vector<16x8xf32>
    %cst_40 = arith.constant 5.000000e-01 : f32
    %88 = vector.broadcast %cst_40 : f32 to vector<16x8xf32>
    %89 = arith.addf %88, %87 : vector<16x8xf32>
    %90 = arith.mulf %83, %64 : vector<16x8xf32>
    %91 = arith.mulf %78, %84 : vector<16x8xf32>
    %92 = arith.addf %90, %91 : vector<16x8xf32>
    %93 = math.tanh %92 : vector<16x8xf32>
    %94 = arith.mulf %89, %93 : vector<16x8xf32>
    %c3 = arith.constant 3 : index
    %c0_41 = arith.constant 0 : index
    %c0_42 = arith.constant 0 : index
    %95 = vector.load %arg0[%c3, %c0_41, %c0_42] : memref<6x16x8xf32, #tpu.memory_space<vmem>>, vector<1x16x8xf32>
    %96 = vector.shape_cast %95 : vector<1x16x8xf32> to vector<16x8xf32>
    %cst_43 = arith.constant dense<0.000000e+00> : vector<64x8xf32>
    %97 = tpu.matmul %0, %96, %cst_43 {dimension_numbers = #tpu.dot_dimension_numbers<[1], [0], [0], [1], [0, 0, 1, 1], [], []>} : vector<64x16xf32>, vector<16x8xf32>, vector<64x8xf32> -> vector<64x8xf32>
    %98 = arith.addf %97, %6 : vector<64x8xf32>
    %cst_44 = arith.constant dense<0.000000e+00> : vector<64x8xf32>
    %99 = tpu.matmul %1, %94, %cst_44 {dimension_numbers = #tpu.dot_dimension_numbers<[1], [0], [0], [1], [0, 0, 1, 1], [], []>} : vector<64x16xf32>, vector<16x8xf32>, vector<64x8xf32> -> vector<64x8xf32>
    %100 = arith.addf %98, %99 : vector<64x8xf32>
    %101 = math.tanh %100 : vector<64x8xf32>
    %102 = vector.extract_strided_slice %101 {offsets = [0, 0], sizes = [16, 8], strides = [1, 1]} : vector<64x8xf32> to vector<16x8xf32>
    %cst_45 = arith.constant 5.000000e-01 : f32
    %103 = vector.broadcast %cst_45 : f32 to vector<16x8xf32>
    %104 = arith.mulf %103, %102 : vector<16x8xf32>
    %cst_46 = arith.constant 5.000000e-01 : f32
    %105 = vector.broadcast %cst_46 : f32 to vector<16x8xf32>
    %106 = arith.addf %105, %104 : vector<16x8xf32>
    %107 = vector.extract_strided_slice %101 {offsets = [16, 0], sizes = [16, 8], strides = [1, 1]} : vector<64x8xf32> to vector<16x8xf32>
    %cst_47 = arith.constant 5.000000e-01 : f32
    %108 = vector.broadcast %cst_47 : f32 to vector<16x8xf32>
    %109 = arith.mulf %108, %107 : vector<16x8xf32>
    %cst_48 = arith.constant 5.000000e-01 : f32
    %110 = vector.broadcast %cst_48 : f32 to vector<16x8xf32>
    %111 = arith.addf %110, %109 : vector<16x8xf32>
    %112 = vector.extract_strided_slice %101 {offsets = [32, 0], sizes = [16, 8], strides = [1, 1]} : vector<64x8xf32> to vector<16x8xf32>
    %113 = vector.extract_strided_slice %101 {offsets = [48, 0], sizes = [16, 8], strides = [1, 1]} : vector<64x8xf32> to vector<16x8xf32>
    %cst_49 = arith.constant 5.000000e-01 : f32
    %114 = vector.broadcast %cst_49 : f32 to vector<16x8xf32>
    %115 = arith.mulf %114, %113 : vector<16x8xf32>
    %cst_50 = arith.constant 5.000000e-01 : f32
    %116 = vector.broadcast %cst_50 : f32 to vector<16x8xf32>
    %117 = arith.addf %116, %115 : vector<16x8xf32>
    %118 = arith.mulf %111, %92 : vector<16x8xf32>
    %119 = arith.mulf %106, %112 : vector<16x8xf32>
    %120 = arith.addf %118, %119 : vector<16x8xf32>
    %121 = math.tanh %120 : vector<16x8xf32>
    %122 = arith.mulf %117, %121 : vector<16x8xf32>
    %c4 = arith.constant 4 : index
    %c0_51 = arith.constant 0 : index
    %c0_52 = arith.constant 0 : index
    %123 = vector.load %arg0[%c4, %c0_51, %c0_52] : memref<6x16x8xf32, #tpu.memory_space<vmem>>, vector<1x16x8xf32>
    %124 = vector.shape_cast %123 : vector<1x16x8xf32> to vector<16x8xf32>
    %cst_53 = arith.constant dense<0.000000e+00> : vector<64x8xf32>
    %125 = tpu.matmul %0, %124, %cst_53 {dimension_numbers = #tpu.dot_dimension_numbers<[1], [0], [0], [1], [0, 0, 1, 1], [], []>} : vector<64x16xf32>, vector<16x8xf32>, vector<64x8xf32> -> vector<64x8xf32>
    %126 = arith.addf %125, %6 : vector<64x8xf32>
    %cst_54 = arith.constant dense<0.000000e+00> : vector<64x8xf32>
    %127 = tpu.matmul %1, %122, %cst_54 {dimension_numbers = #tpu.dot_dimension_numbers<[1], [0], [0], [1], [0, 0, 1, 1], [], []>} : vector<64x16xf32>, vector<16x8xf32>, vector<64x8xf32> -> vector<64x8xf32>
    %128 = arith.addf %126, %127 : vector<64x8xf32>
    %129 = math.tanh %128 : vector<64x8xf32>
    %130 = vector.extract_strided_slice %129 {offsets = [0, 0], sizes = [16, 8], strides = [1, 1]} : vector<64x8xf32> to vector<16x8xf32>
    %cst_55 = arith.constant 5.000000e-01 : f32
    %131 = vector.broadcast %cst_55 : f32 to vector<16x8xf32>
    %132 = arith.mulf %131, %130 : vector<16x8xf32>
    %cst_56 = arith.constant 5.000000e-01 : f32
    %133 = vector.broadcast %cst_56 : f32 to vector<16x8xf32>
    %134 = arith.addf %133, %132 : vector<16x8xf32>
    %135 = vector.extract_strided_slice %129 {offsets = [16, 0], sizes = [16, 8], strides = [1, 1]} : vector<64x8xf32> to vector<16x8xf32>
    %cst_57 = arith.constant 5.000000e-01 : f32
    %136 = vector.broadcast %cst_57 : f32 to vector<16x8xf32>
    %137 = arith.mulf %136, %135 : vector<16x8xf32>
    %cst_58 = arith.constant 5.000000e-01 : f32
    %138 = vector.broadcast %cst_58 : f32 to vector<16x8xf32>
    %139 = arith.addf %138, %137 : vector<16x8xf32>
    %140 = vector.extract_strided_slice %129 {offsets = [32, 0], sizes = [16, 8], strides = [1, 1]} : vector<64x8xf32> to vector<16x8xf32>
    %141 = vector.extract_strided_slice %129 {offsets = [48, 0], sizes = [16, 8], strides = [1, 1]} : vector<64x8xf32> to vector<16x8xf32>
    %cst_59 = arith.constant 5.000000e-01 : f32
    %142 = vector.broadcast %cst_59 : f32 to vector<16x8xf32>
    %143 = arith.mulf %142, %141 : vector<16x8xf32>
    %cst_60 = arith.constant 5.000000e-01 : f32
    %144 = vector.broadcast %cst_60 : f32 to vector<16x8xf32>
    %145 = arith.addf %144, %143 : vector<16x8xf32>
    %146 = arith.mulf %139, %120 : vector<16x8xf32>
    %147 = arith.mulf %134, %140 : vector<16x8xf32>
    %148 = arith.addf %146, %147 : vector<16x8xf32>
    %149 = math.tanh %148 : vector<16x8xf32>
    %150 = arith.mulf %145, %149 : vector<16x8xf32>
    %c5 = arith.constant 5 : index
    %c0_61 = arith.constant 0 : index
    %c0_62 = arith.constant 0 : index
    %151 = vector.load %arg0[%c5, %c0_61, %c0_62] : memref<6x16x8xf32, #tpu.memory_space<vmem>>, vector<1x16x8xf32>
    %152 = vector.shape_cast %151 : vector<1x16x8xf32> to vector<16x8xf32>
    %cst_63 = arith.constant dense<0.000000e+00> : vector<64x8xf32>
    %153 = tpu.matmul %0, %152, %cst_63 {dimension_numbers = #tpu.dot_dimension_numbers<[1], [0], [0], [1], [0, 0, 1, 1], [], []>} : vector<64x16xf32>, vector<16x8xf32>, vector<64x8xf32> -> vector<64x8xf32>
    %154 = arith.addf %153, %6 : vector<64x8xf32>
    %cst_64 = arith.constant dense<0.000000e+00> : vector<64x8xf32>
    %155 = tpu.matmul %1, %150, %cst_64 {dimension_numbers = #tpu.dot_dimension_numbers<[1], [0], [0], [1], [0, 0, 1, 1], [], []>} : vector<64x16xf32>, vector<16x8xf32>, vector<64x8xf32> -> vector<64x8xf32>
    %156 = arith.addf %154, %155 : vector<64x8xf32>
    %157 = math.tanh %156 : vector<64x8xf32>
    %158 = vector.extract_strided_slice %157 {offsets = [0, 0], sizes = [16, 8], strides = [1, 1]} : vector<64x8xf32> to vector<16x8xf32>
    %cst_65 = arith.constant 5.000000e-01 : f32
    %159 = vector.broadcast %cst_65 : f32 to vector<16x8xf32>
    %160 = arith.mulf %159, %158 : vector<16x8xf32>
    %cst_66 = arith.constant 5.000000e-01 : f32
    %161 = vector.broadcast %cst_66 : f32 to vector<16x8xf32>
    %162 = arith.addf %161, %160 : vector<16x8xf32>
    %163 = vector.extract_strided_slice %157 {offsets = [16, 0], sizes = [16, 8], strides = [1, 1]} : vector<64x8xf32> to vector<16x8xf32>
    %cst_67 = arith.constant 5.000000e-01 : f32
    %164 = vector.broadcast %cst_67 : f32 to vector<16x8xf32>
    %165 = arith.mulf %164, %163 : vector<16x8xf32>
    %cst_68 = arith.constant 5.000000e-01 : f32
    %166 = vector.broadcast %cst_68 : f32 to vector<16x8xf32>
    %167 = arith.addf %166, %165 : vector<16x8xf32>
    %168 = vector.extract_strided_slice %157 {offsets = [32, 0], sizes = [16, 8], strides = [1, 1]} : vector<64x8xf32> to vector<16x8xf32>
    %169 = vector.extract_strided_slice %157 {offsets = [48, 0], sizes = [16, 8], strides = [1, 1]} : vector<64x8xf32> to vector<16x8xf32>
    %cst_69 = arith.constant 5.000000e-01 : f32
    %170 = vector.broadcast %cst_69 : f32 to vector<16x8xf32>
    %171 = arith.mulf %170, %169 : vector<16x8xf32>
    %cst_70 = arith.constant 5.000000e-01 : f32
    %172 = vector.broadcast %cst_70 : f32 to vector<16x8xf32>
    %173 = arith.addf %172, %171 : vector<16x8xf32>
    %174 = arith.mulf %167, %148 : vector<16x8xf32>
    %175 = arith.mulf %162, %168 : vector<16x8xf32>
    %176 = arith.addf %174, %175 : vector<16x8xf32>
    %177 = math.tanh %176 : vector<16x8xf32>
    %178 = arith.mulf %173, %177 : vector<16x8xf32>
    %cst_71 = arith.constant dense<0.000000e+00> : vector<8x8xf32>
    %179 = tpu.matmul %3, %178, %cst_71 {dimension_numbers = #tpu.dot_dimension_numbers<[1], [0], [0], [1], [0, 0, 1, 1], [], []>} : vector<8x16xf32>, vector<16x8xf32>, vector<8x8xf32> -> vector<8x8xf32>
    %180 = vector.shape_cast %4 : vector<8x1xf32> to vector<8x1xf32>
    %181 = vector.broadcast %180 : vector<8x1xf32> to vector<8x8xf32>
    %182 = arith.addf %179, %181 : vector<8x8xf32>
    %c0_72 = arith.constant 0 : index
    %c0_73 = arith.constant 0 : index
    %183 = vector.load %arg3[%c0_72, %c0_73] : memref<8x8xf32, #tpu.memory_space<vmem>>, vector<8x8xf32>
    tpu.vector_store %arg3[%c0_72, %c0_73], %182 {strides = array<i32>} : memref<8x8xf32, #tpu.memory_space<vmem>>, vector<8x8xf32>,
    return
  }
}

</mosaic_0001>

<bundles_post_ra>
// kernel: tpu_custom_call.1
= control target key start
LH: loop header
LB: loop body
LE: loop exit
PB: predicated region body
PF: predicated region fallthrough
CT: control target
= control target key end

     0   :  { %vm88_vm0 = vcmask 130048   ;;  %v2463_v4 = vmov 0   ;;  %s2955_s0 = inlined_call_operand.vmem [shape: f32[6,16,8], index: 0, kind: input, shape index: {}]   ;;  %s2956_s1 = inlined_call_operand.vmem [shape: f32[208,16], index: 1, kind: input, shape index: {}]   ;;  %s2957_s2 = inlined_call_operand.vmem [shape: f32[2,16,8], index: 2, kind: input, shape index: {}]   ;;  %s2958_s3 = inlined_call_operand.hbm [shape: f32[8,8], index: 3, kind: output, shape index: {}]  }
   0x1   :  { %v86_v0 = vld [vmem:[%s2955_s0] sm:$0xff]  ;;  %v87_v1 = vld [vmem:[%s2955_s0 + $0x8] sm:$0xff]  ;;  %2317 = vset.pattern.permute.xlu0 %v2463_v4  ;;  %2318 = vset.pattern.permute.xlu1 %v2463_v4  ;;  %v2517_v9 = vld [vmem:[%s2956_s1 + $0x10] sm:$0xff] }
   0x2   :  { %v2497_v2 = vld [vmem:[%s2956_s1] sm:$0xff]  ;;  %v2165_v3 = vpack.c.bf16 %v87_v1, %v86_v0  ;;  %v82_v6 = vld [vmem:[%s2957_s2 + $0x8] sm:$0xff]  ;;  %v33_v11 = vld [vmem:[%s2956_s1 + $0x90] sm:$0xff] }
   0x3   :  { %1970 = vmatprep.mubr.msk.f32.mxu0 %vm88_vm0, %v2497_v2  ;;  %2002 = vmatprep.mubr.msk.f32.mxu1 %vm88_vm0, %v2497_v2  ;;  %v81_v5 = vld [vmem:[%s2957_s2] sm:$0xff]  ;;  %v2512_v7 = vld [vmem:[%s2956_s1 + $0x8] sm:$0xff]  ;;  %v2532_v12 = vld [vmem:[%s2956_s1 + $0x18] sm:$0xff] }
   0x4   :  { %2166 = vmatprep.subr.bf16.mxu0 %v2165_v3  ;;  %v2169_v8 = vpack.c.bf16 %v82_v6, %v81_v5  ;;  %v31_v10 = vld [vmem:[%s2956_s1 + $0x80] sm:$0xff]  ;;  %v32_v13 = vld [vmem:[%s2956_s1 + $0x88] sm:$0xff]  ;;  %53 = vperm.xlu1 %2318, %v33_v11  }
   0x5   :  { %2168 = vmatpush3.bf16.msra.mxu0 %v2165_v3  ;;  %43 = vperm.xlu0 %2317, %v31_v10   ;;  %v2540_v14 = vld [vmem:[%s2956_s1 + $0x20] sm:$0xff] }
   0x6   :  { %2170 = vmatprep.subr.bf16.mxu0 %v2169_v8 }
   0x8   :  { %1971 = vmatmul.mubr.msk.f32.vlgmr.msra.gmra.mrb[0].mxu0 %vm88_vm0, %v2512_v7 }
   0x9   :  { %1973 = vmatprep.mubr.msk.f32.mxu0 %vm88_vm0, %v2517_v9  ;;  %2172 = vmatpush3.bf16.msra.mxu0 %v2169_v8 }
   0xa   :  { %8 = vsyncpa [#allocation3], 0  ;;  %v34_v15 = vld [vmem:[%s2956_s1 + $0x98] sm:$0xff]  ;;  %48 = vperm.xlu0 %2317, %v32_v13   ;;  %v2552_v16 = vld [vmem:[%s2956_s1 + $0x28] sm:$0xff]  ;;  %vm2465_vm1 = vmmov 0   ;;  %s2467_s13 = smov [#allocation2]  }
   0xb   :  { %v35_v17 = vld [vmem:[%s2956_s1 + $0xa0] sm:$0xff]  ;;  %v2560_v18 = vld [vmem:[%s2956_s1 + $0x30] sm:$0xff]  ;;  %58 = vperm.xlu1 %2318, %v34_v15   ;;  %v36_v19 = vld [vmem:[%s2956_s1 + $0xa8] sm:$0xff]  ;;  %s1726_s14 = sshll.u32 %s2467_s13, 4  ;;  %vm1718_vm2 = vcmask 64512   ;;  %s1727_s14 = int_to_ptr.vmem [resolvable:$true] %s1726_s14 }
   0xc   :  { %1974 = vmatmul.mubr.msk.f32.gmra.mrb[2].mxu0 %vm88_vm0, %v2532_v12  ;;  %v2572_v20 = vld [vmem:[%s2956_s1 + $0x38] sm:$0xff]  ;;  %v37_v21 = vld [vmem:[%s2956_s1 + $0xb0] sm:$0xff]  ;;  %v2580_v22 = vld [vmem:[%s2956_s1 + $0x40] sm:$0xff]  ;;  %s2439_s15 = scalar_lea.vmem %s1727_s14, 128  ;;  %p2444_p1 = scmp.lt.s32.totalorder %s1727_s14, %s1727_s14 }
   0xd   :  { %1976 = vmatprep.mubr.msk.f32.mxu0 %vm88_vm0, %v2540_v14  ;;  %v38_v23 = vld [vmem:[%s2956_s1 + $0xb8] sm:$0xff]  ;;  %v2592_v24 = vld [vmem:[%s2956_s1 + $0x48] sm:$0xff]  ;;  %v2600_v26 = vld [vmem:[%s2956_s1 + $0x50] sm:$0xff]  ;;  %p2440_p0 = scmp.ne.s32.totalorder %s1727_s14, %s2439_s15  ;;  %p2445_p2 = scmp.lt.s32.totalorder %s2439_s15, %s2439_s15 }
   0xe   :  { %63 = vperm.xlu0 %2317, %v35_v17   ;;  %v40_v25 = vld [vmem:[%s2956_s1 + $0xc8] sm:$0xff]  ;;  %v2609_v27 = vld [vmem:[%s2956_s1 + $0x58] sm:$0xff]  ;;  %v2614_v28 = vld [vmem:[%s2956_s1 + $0x60] sm:$0xff] }
   0xf   :  { %68 = vperm.xlu1 %2318, %v36_v19   ;;  %v2623_v29 = vld [vmem:[%s2956_s1 + $0x68] sm:$0xff]  ;;  %v2628_v30 = vld [vmem:[%s2956_s1 + $0x70] sm:$0xff]  ;;  %v2637_v31 = vld [vmem:[%s2956_s1 + $0x78] sm:$0xff]  ;;  %p2446_p3 = por %p2445_p2, %p2444_p1 }
  0x10   :  { %1977 = vmatmul.mubr.msk.f32.gmra.mrb[4].mxu0 %vm88_vm0, %v2552_v16  ;;  %v1752_v32 = vld [vmem:[%s2955_s0 + $0x10] sm:$0xff]  ;;  %v1753_v33 = vld [vmem:[%s2955_s0 + $0x18] sm:$0xff] }
  0x11   :  { %1979 = vmatprep.mubr.msk.f32.mxu0 %vm88_vm0, %v2560_v18  ;;  %v2173_v34 = vpack.c.bf16 %v1753_v33, %v1752_v32  ;;  %v1735_v3 = vld [vmem:[%s2957_s2 + $0x18] sm:$0xff]  ;;  %v1734_v8 = vld [vmem:[%s2957_s2 + $0x10] sm:$0xff]  ;;  %p2447_p4 = pnand %p2446_p3, %p2440_p0 }
  0x12   :  { %73 = vperm.xlu0 %2317, %v37_v21  }
  0x13   :  { %78 = vperm.xlu1 %2318, %v38_v23   ;;  %2174 = vmatprep.subr.bf16.mxu1 %v2173_v34 }
  0x14   :  { %1980 = vmatmul.mubr.msk.f32.gmra.mrb[6].mxu0 %vm88_vm0, %v2572_v20  ;;  %2176 = vmatpush3.bf16.msra.mxu1 %v2173_v34 }
  0x15   :  { %1986 = vmatprep.mubr.msk.f32.mxu0 %vm88_vm0, %v2580_v22 }
  0x16   :  { %1642 = vperm.xlu0 %2317, %v40_v25  }
  0x17   :  { %2003 = vmatmul.mubr.msk.f32.vlgmr.msra.gmra.mrb[0].mxu1 %vm88_vm0, %v2512_v7 }
  0x18   :  { %1987 = vmatmul.mubr.msk.f32.vlgmr.msra.gmra.mrb[0].mxu0 %vm88_vm0, %v2592_v24  ;;  %2005 = vmatprep.mubr.msk.f32.mxu1 %vm88_vm0, %v2517_v9 }
  0x19   :  { %1989 = vmatprep.mubr.msk.f32.mxu0 %vm88_vm0, %v2600_v26 }
  0x1b   :  { %2006 = vmatmul.mubr.msk.f32.gmra.mrb[2].mxu1 %vm88_vm0, %v2532_v12 }
  0x1c   :  { %1990 = vmatmul.mubr.msk.f32.gmra.mrb[2].mxu0 %vm88_vm0, %v2609_v27  ;;  %2008 = vmatprep.mubr.msk.f32.mxu1 %vm88_vm0, %v2540_v14 }
  0x1d   :  { %1992 = vmatprep.mubr.msk.f32.mxu0 %vm88_vm0, %v2614_v28 }
  0x1f   :  { %2009 = vmatmul.mubr.msk.f32.gmra.mrb[4].mxu1 %vm88_vm0, %v2552_v16 }
  0x20   :  { %1993 = vmatmul.mubr.msk.f32.gmra.mrb[4].mxu0 %vm88_vm0, %v2623_v29  ;;  %2011 = vmatprep.mubr.msk.f32.mxu1 %vm88_vm0, %v2560_v18 }
  0x21   :  { %1995 = vmatprep.mubr.msk.f32.mxu0 %vm88_vm0, %v2628_v30 }
  0x23   :  { %2012 = vmatmul.mubr.msk.f32.gmra.mrb[6].mxu1 %vm88_vm0, %v2572_v20 }
  0x24   :  { %1996 = vmatmul.mubr.msk.f32.gmra.mrb[6].mxu0 %vm88_vm0, %v2637_v31  ;;  %2018 = vmatprep.mubr.msk.f32.mxu1 %vm88_vm0, %v2580_v22 }
  0x25   :  { %2034 = vmatprep.mubr.msk.f32.mxu0 %vm88_vm0, %v2497_v2 }
  0x83   :  { %v2667_v36 = vpop.permute.xlu1 %53 }
  0x84   :  { %v2665_v35 = vpop.permute.xlu0 %43 }
  0x89   :  { %v2669_v37 = vpop.permute.xlu0 %48 }
  0x8a   :  { %v2671_v39 = vpop.permute.xlu1 %58 }
  0x8d   :  { %v2679_v48 = vpop.permute.xlu0 %63 }
  0x8e   :  { %v2677_v47 = vpop.permute.xlu1 %68 }
  0x91   :  { %v2685_v58 = vpop.permute.xlu0 %73 }
  0x92   :  { %v2683_v55 = vpop.permute.xlu1 %78 }
  0xeb   :  { %v1988_v38 = vpop.f32.mrb[0].mxu0 }
  0xec   :  { %v2216_v40 = vadd.f32 %v1988_v38, %v2669_v37  ;;  %v308_v41 = vpop.f32.mrb[1].mxu0 }
  0xed   :  { %v2217_v42 = vadd.f32 %v308_v41, %v2665_v35 }
  0xee   :  { %2319 = vtanh.f32 %v2216_v40 }
  0xef   :  { %2321 = vtanh.f32 %v2217_v42  ;;  %v1991_v43 = vpop.f32.mrb[2].mxu0 }
  0xf0   :  { %v2218_v44 = vadd.f32 %v1991_v43, %v2671_v39  ;;  %v318_v45 = vpop.f32.mrb[3].mxu0 }
  0xf1   :  { %v2219_v46 = vadd.f32 %v318_v45, %v2667_v36 }
  0xf2   :  { %2323 = vtanh.f32 %v2218_v44 }
  0xf3   :  { %2325 = vtanh.f32 %v2219_v46  ;;  %v1994_v49 = vpop.f32.mrb[4].mxu0 }
  0xf4   :  { %v2220_v50 = vadd.f32 %v1994_v49, %v2677_v47  ;;  %v328_v51 = vpop.f32.mrb[5].mxu0 }
  0xf5   :  { %v2221_v52 = vadd.f32 %v328_v51, %v2679_v48  ;;  %v1771_v51 = vld [vmem:[%s2955_s0 + $0x28] sm:$0xff] }
  0xf6   :  { %2327 = vtanh.f32 %v2220_v50  ;;  %v1770_v50 = vld [vmem:[%s2955_s0 + $0x20] sm:$0xff] }
  0xf7   :  { %2329 = vtanh.f32 %v2221_v52  ;;  %v1997_v53 = vpop.f32.mrb[6].mxu0  ;;  %v2181_v52 = vpack.c.bf16 %v1771_v51, %v1770_v50 }
  0xf8   :  { %v2320_v54 = vpop.eup %2319  ;;  %v338_v56 = vpop.f32.mrb[7].mxu0  ;;  %v2222_v59 = vadd.f32 %v1997_v53, %v2683_v55 }
  0xf9   :  { %v2322_v57 = vpop.eup %2321  ;;  %v2223_v60 = vadd.f32 %v338_v56, %v2685_v58  ;;  %v364_v61 = vmul.f32 0.5, %v2320_v54  ;;  %2182 = vmatprep.subr.bf16.mxu0 %v2181_v52 }
  0xfa   :  { %v363_v63 = vmul.f32 0.5, %v2322_v57  ;;  %2331 = vtanh.f32 %v2222_v59  ;;  %2184 = vmatpush3.bf16.msra.mxu0 %v2181_v52 }
  0xfb   :  { %2333 = vtanh.f32 %v2223_v60  ;;  %v366_v5 = vadd.f32 0.5, %v364_v61 }
  0xfc   :  { %v2324_v62 = vpop.eup %2323  ;;  %v365_v11 = vadd.f32 0.5, %v363_v63 }
  0xfd   :  { %v2326_v0 = vpop.eup %2325  ;;  %v368_v1 = vmul.f32 0.5, %v2324_v62  ;;  %2035 = vmatmul.mubr.msk.f32.vlgmr.msra.gmra.mrb[8].mxu0 %vm88_vm0, %v2512_v7 }
  0xfe   :  { %v367_v4 = vmul.f32 0.5, %v2326_v0  ;;  %2037 = vmatprep.mubr.msk.f32.mxu0 %vm88_vm0, %v2517_v9 }
  0xff   :  { %v370_v6 = vadd.f32 0.5, %v368_v1 }
 0x100   :  { %v2328_v10 = vpop.eup %2327  ;;  %v369_v13 = vadd.f32 0.5, %v367_v4 }
 0x101   :  { %v2330_v15 = vpop.eup %2329  ;;  %v376_v17 = vmul.f32 %v1735_v3, %v370_v6  ;;  %v378_v19 = vmul.f32 %v2328_v10, %v366_v5  ;;  %2038 = vmatmul.mubr.msk.f32.gmra.mrb[10].mxu0 %vm88_vm0, %v2532_v12 }
 0x102   :  { %v375_v21 = vmul.f32 %v1734_v8, %v369_v13  ;;  %v377_v23 = vmul.f32 %v2330_v15, %v365_v11  ;;  %2040 = vmatprep.mubr.msk.f32.mxu0 %vm88_vm0, %v2540_v14 }
 0x103   :  { %v2695_v25 = vadd.f32 %v378_v19, %v376_v17 }
 0x104   :  { %v2697_v32 = vadd.f32 %v377_v23, %v375_v21  ;;  %v2332_v33 = vpop.eup %2331 }
 0x105   :  { %2335 = vtanh.f32 %v2695_v25  ;;  %v2334_v34 = vpop.eup %2333  ;;  %v372_v38 = vmul.f32 0.5, %v2332_v33  ;;  %2041 = vmatmul.mubr.msk.f32.gmra.mrb[12].mxu0 %vm88_vm0, %v2552_v16 }
 0x106   :  { %2337 = vtanh.f32 %v2697_v32  ;;  %v371_v40 = vmul.f32 0.5, %v2334_v34  ;;  %2043 = vmatprep.mubr.msk.f32.mxu0 %vm88_vm0, %v2560_v18 }
 0x107   :  { %v374_v41 = vadd.f32 0.5, %v372_v38 }
 0x108   :  { %v373_v43 = vadd.f32 0.5, %v371_v40 }
 0x109   :  { %2044 = vmatmul.mubr.msk.f32.gmra.mrb[14].mxu0 %vm88_vm0, %v2572_v20 }
 0x10a   :  { %2050 = vmatprep.mubr.msk.f32.mxu0 %vm88_vm0, %v2580_v22 }
 0x10f   :  { %v2336_v42 = vpop.eup %2335 }
 0x110   :  { %v2338_v44 = vpop.eup %2337  ;;  %v384_v45 = vmul.f32 %v2336_v42, %v374_v41 }
 0x111   :  { %v383_v46 = vmul.f32 %v2338_v44, %v373_v43 }
 0x113   :  { %v2177_v49 = vpack.c.bf16 %v384_v45, %v383_v46 }
 0x115   :  { %2178 = vmatprep.subr.bf16.mxu1 %v2177_v49 }
 0x116   :  { %2180 = vmatpush3.bf16.msra.mxu1 %v2177_v49 }
 0x119   :  { %2019 = vmatmul.mubr.msk.f32.vlgmr.msra.gmra.mrb[0].mxu1 %vm88_vm0, %v2592_v24 }
 0x11a   :  { %2021 = vmatprep.mubr.msk.f32.mxu1 %vm88_vm0, %v2600_v26 }
 0x11d   :  { %2022 = vmatmul.mubr.msk.f32.gmra.mrb[2].mxu1 %vm88_vm0, %v2609_v27 }
 0x11e   :  { %2024 = vmatprep.mubr.msk.f32.mxu1 %vm88_vm0, %v2614_v28 }
 0x121   :  { %2025 = vmatmul.mubr.msk.f32.gmra.mrb[4].mxu1 %vm88_vm0, %v2623_v29 }
 0x122   :  { %2027 = vmatprep.mubr.msk.f32.mxu1 %vm88_vm0, %v2628_v30 }
 0x125   :  { %2028 = vmatmul.mubr.msk.f32.gmra.mrb[6].mxu1 %vm88_vm0, %v2637_v31 }
 0x126   :  { %2066 = vmatprep.mubr.msk.f32.mxu1 %vm88_vm0, %v2497_v2 }
 0x1ec   :  { %v2020_v53 = vpop.f32.mrb[0].mxu1 }
 0x1ed   :  { %v2224_v54 = vadd.f32 %v2020_v53, %v2669_v37  ;;  %v559_v56 = vpop.f32.mrb[1].mxu1 }
 0x1ee   :  { %v2225_v57 = vadd.f32 %v559_v56, %v2665_v35 }
 0x1ef   :  { %2339 = vtanh.f32 %v2224_v54 }
 0x1f0   :  { %2341 = vtanh.f32 %v2225_v57  ;;  %v2023_v59 = vpop.f32.mrb[2].mxu1 }
 0x1f1   :  { %v2226_v60 = vadd.f32 %v2023_v59, %v2671_v39  ;;  %v569_v61 = vpop.f32.mrb[3].mxu1 }
 0x1f2   :  { %v2227_v62 = vadd.f32 %v569_v61, %v2667_v36 }
 0x1f3   :  { %2343 = vtanh.f32 %v2226_v60 }
 0x1f4   :  { %2345 = vtanh.f32 %v2227_v62  ;;  %v2026_v63 = vpop.f32.mrb[4].mxu1  ;;  %v1788_v62 = vld [vmem:[%s2955_s0 + $0x30] sm:$0xff] }
 0x1f5   :  { %v2228_v0 = vadd.f32 %v2026_v63, %v2677_v47  ;;  %v579_v1 = vpop.f32.mrb[5].mxu1  ;;  %v1789_v63 = vld [vmem:[%s2955_s0 + $0x38] sm:$0xff] }
 0x1f6   :  { %v2229_v3 = vadd.f32 %v579_v1, %v2679_v48 }
 0x1f7   :  { %2347 = vtanh.f32 %v2228_v0  ;;  %v2189_v0 = vpack.c.bf16 %v1789_v63, %v1788_v62 }
 0x1f8   :  { %2349 = vtanh.f32 %v2229_v3  ;;  %v2029_v4 = vpop.f32.mrb[6].mxu1 }
 0x1f9   :  { %v2340_v5 = vpop.eup %2339  ;;  %v589_v6 = vpop.f32.mrb[7].mxu1  ;;  %v2230_v10 = vadd.f32 %v2029_v4, %v2683_v55  ;;  %2190 = vmatprep.subr.bf16.mxu1 %v2189_v0 }
 0x1fa   :  { %v2342_v8 = vpop.eup %2341  ;;  %v2231_v11 = vadd.f32 %v589_v6, %v2685_v58  ;;  %v615_v13 = vmul.f32 0.5, %v2340_v5  ;;  %2192 = vmatpush3.bf16.msra.mxu1 %v2189_v0 }
 0x1fb   :  { %v614_v17 = vmul.f32 0.5, %v2342_v8  ;;  %2351 = vtanh.f32 %v2230_v10 }
 0x1fc   :  { %2353 = vtanh.f32 %v2231_v11  ;;  %v617_v33 = vadd.f32 0.5, %v615_v13 }
 0x1fd   :  { %v2344_v15 = vpop.eup %2343  ;;  %v616_v40 = vadd.f32 0.5, %v614_v17  ;;  %2067 = vmatmul.mubr.msk.f32.vlgmr.msra.gmra.mrb[8].mxu1 %vm88_vm0, %v2512_v7 }
 0x1fe   :  { %v2346_v19 = vpop.eup %2345  ;;  %v619_v21 = vmul.f32 0.5, %v2344_v15  ;;  %2069 = vmatprep.mubr.msk.f32.mxu1 %vm88_vm0, %v2517_v9 }
 0x1ff   :  { %v618_v23 = vmul.f32 0.5, %v2346_v19 }
 0x200   :  { %v621_v34 = vadd.f32 0.5, %v619_v21 }
 0x201   :  { %v2348_v38 = vpop.eup %2347  ;;  %v620_v41 = vadd.f32 0.5, %v618_v23  ;;  %2070 = vmatmul.mubr.msk.f32.gmra.mrb[10].mxu1 %vm88_vm0, %v2532_v12 }
 0x202   :  { %v2350_v42 = vpop.eup %2349  ;;  %v627_v43 = vmul.f32 %v621_v34, %v2695_v25  ;;  %v629_v44 = vmul.f32 %v2348_v38, %v617_v33  ;;  %2072 = vmatprep.mubr.msk.f32.mxu1 %vm88_vm0, %v2540_v14 }
 0x203   :  { %v626_v45 = vmul.f32 %v620_v41, %v2697_v32  ;;  %v628_v46 = vmul.f32 %v2350_v42, %v616_v40 }
 0x204   :  { %v2749_v49 = vadd.f32 %v629_v44, %v627_v43 }
 0x205   :  { %v2751_v50 = vadd.f32 %v628_v46, %v626_v45  ;;  %v2352_v51 = vpop.eup %2351  ;;  %2073 = vmatmul.mubr.msk.f32.gmra.mrb[12].mxu1 %vm88_vm0, %v2552_v16 }
 0x206   :  { %2355 = vtanh.f32 %v2749_v49  ;;  %v2354_v52 = vpop.eup %2353  ;;  %v623_v53 = vmul.f32 0.5, %v2352_v51  ;;  %2075 = vmatprep.mubr.msk.f32.mxu1 %vm88_vm0, %v2560_v18 }
 0x207   :  { %2357 = vtanh.f32 %v2751_v50  ;;  %v622_v54 = vmul.f32 0.5, %v2354_v52 }
 0x208   :  { %v625_v56 = vadd.f32 0.5, %v623_v53 }
 0x209   :  { %v624_v59 = vadd.f32 0.5, %v622_v54  ;;  %2076 = vmatmul.mubr.msk.f32.gmra.mrb[14].mxu1 %vm88_vm0, %v2572_v20 }
 0x20a   :  { %2082 = vmatprep.mubr.msk.f32.mxu1 %vm88_vm0, %v2580_v22 }
 0x210   :  { %v2356_v57 = vpop.eup %2355 }
 0x211   :  { %v2358_v25 = vpop.eup %2357  ;;  %v635_v60 = vmul.f32 %v2356_v57, %v625_v56 }
 0x212   :  { %v634_v61 = vmul.f32 %v2358_v25, %v624_v59 }
 0x214   :  { %v2185_v32 = vpack.c.bf16 %v635_v60, %v634_v61 }
 0x216   :  { %2186 = vmatprep.subr.bf16.mxu0 %v2185_v32 }
 0x217   :  { %2188 = vmatpush3.bf16.msra.mxu0 %v2185_v32 }
 0x21a   :  { %2051 = vmatmul.mubr.msk.f32.vlgmr.msra.gmra.mrb[8].mxu0 %vm88_vm0, %v2592_v24 }
 0x21b   :  { %2053 = vmatprep.mubr.msk.f32.mxu0 %vm88_vm0, %v2600_v26 }
 0x21e   :  { %2054 = vmatmul.mubr.msk.f32.gmra.mrb[10].mxu0 %vm88_vm0, %v2609_v27 }
 0x21f   :  { %2056 = vmatprep.mubr.msk.f32.mxu0 %vm88_vm0, %v2614_v28 }
 0x222   :  { %2057 = vmatmul.mubr.msk.f32.gmra.mrb[12].mxu0 %vm88_vm0, %v2623_v29 }
 0x223   :  { %2059 = vmatprep.mubr.msk.f32.mxu0 %vm88_vm0, %v2628_v30 }
 0x226   :  { %2060 = vmatmul.mubr.msk.f32.gmra.mrb[14].mxu0 %vm88_vm0, %v2637_v31 }
 0x227   :  { %2098 = vmatprep.mubr.msk.f32.mxu0 %vm88_vm0, %v2497_v2 }
 0x2ed   :  { %v2052_v1 = vpop.f32.mrb[8].mxu0 }
 0x2ee   :  { %v2232_v3 = vadd.f32 %v2052_v1, %v2669_v37  ;;  %v810_v4 = vpop.f32.mrb[9].mxu0 }
 0x2ef   :  { %v2233_v5 = vadd.f32 %v810_v4, %v2665_v35 }
 0x2f0   :  { %2359 = vtanh.f32 %v2232_v3 }
 0x2f1   :  { %2361 = vtanh.f32 %v2233_v5  ;;  %v2055_v6 = vpop.f32.mrb[10].mxu0 }
 0x2f2   :  { %v2234_v8 = vadd.f32 %v2055_v6, %v2671_v39  ;;  %v820_v10 = vpop.f32.mrb[11].mxu0 }
 0x2f3   :  { %v2235_v11 = vadd.f32 %v820_v10, %v2667_v36 }
 0x2f4   :  { %2363 = vtanh.f32 %v2234_v8 }
 0x2f5   :  { %2365 = vtanh.f32 %v2235_v11  ;;  %v2058_v13 = vpop.f32.mrb[12].mxu0  ;;  %v1806_v11 = vld [vmem:[%s2955_s0 + $0x40] sm:$0xff] }
 0x2f6   :  { %v2236_v15 = vadd.f32 %v2058_v13, %v2677_v47  ;;  %v830_v17 = vpop.f32.mrb[13].mxu0  ;;  %v1807_v13 = vld [vmem:[%s2955_s0 + $0x48] sm:$0xff] }
 0x2f7   :  { %v2237_v19 = vadd.f32 %v830_v17, %v2679_v48 }
 0x2f8   :  { %2367 = vtanh.f32 %v2236_v15  ;;  %v2197_v15 = vpack.c.bf16 %v1807_v13, %v1806_v11 }
 0x2f9   :  { %2369 = vtanh.f32 %v2237_v19  ;;  %v2061_v21 = vpop.f32.mrb[14].mxu0 }
 0x2fa   :  { %v2360_v23 = vpop.eup %2359  ;;  %v840_v33 = vpop.f32.mrb[15].mxu0  ;;  %v2238_v38 = vadd.f32 %v2061_v21, %v2683_v55  ;;  %2198 = vmatprep.subr.bf16.mxu0 %v2197_v15 }
 0x2fb   :  { %v2362_v34 = vpop.eup %2361  ;;  %v2239_v40 = vadd.f32 %v840_v33, %v2685_v58  ;;  %v866_v41 = vmul.f32 0.5, %v2360_v23  ;;  %2200 = vmatpush3.bf16.msra.mxu0 %v2197_v15 }
 0x2fc   :  { %v865_v43 = vmul.f32 0.5, %v2362_v34  ;;  %2371 = vtanh.f32 %v2238_v38 }
 0x2fd   :  { %2373 = vtanh.f32 %v2239_v40  ;;  %v868_v51 = vadd.f32 0.5, %v866_v41 }
 0x2fe   :  { %v2364_v42 = vpop.eup %2363  ;;  %v867_v54 = vadd.f32 0.5, %v865_v43  ;;  %2099 = vmatmul.mubr.msk.f32.vlgmr.msra.gmra.mrb[16].mxu0 %vm88_vm0, %v2512_v7 }
 0x2ff   :  { %v2366_v44 = vpop.eup %2365  ;;  %v870_v45 = vmul.f32 0.5, %v2364_v42  ;;  %2101 = vmatprep.mubr.msk.f32.mxu0 %vm88_vm0, %v2517_v9 }
 0x300   :  { %v869_v46 = vmul.f32 0.5, %v2366_v44 }
 0x301   :  { %v872_v52 = vadd.f32 0.5, %v870_v45 }
 0x302   :  { %v2368_v53 = vpop.eup %2367  ;;  %v871_v56 = vadd.f32 0.5, %v869_v46  ;;  %2102 = vmatmul.mubr.msk.f32.gmra.mrb[18].mxu0 %vm88_vm0, %v2532_v12 }
 0x303   :  { %v2370_v57 = vpop.eup %2369  ;;  %v878_v59 = vmul.f32 %v872_v52, %v2749_v49  ;;  %v880_v25 = vmul.f32 %v2368_v53, %v868_v51  ;;  %2104 = vmatprep.mubr.msk.f32.mxu0 %vm88_vm0, %v2540_v14 }
 0x304   :  { %v877_v60 = vmul.f32 %v871_v56, %v2751_v50  ;;  %v879_v61 = vmul.f32 %v2370_v57, %v867_v54 }
 0x305   :  { %v2803_v32 = vadd.f32 %v880_v25, %v878_v59 }
 0x306   :  { %v2805_v62 = vadd.f32 %v879_v61, %v877_v60  ;;  %v2372_v63 = vpop.eup %2371  ;;  %2105 = vmatmul.mubr.msk.f32.gmra.mrb[20].mxu0 %vm88_vm0, %v2552_v16 }
 0x307   :  { %2375 = vtanh.f32 %v2803_v32  ;;  %v2374_v0 = vpop.eup %2373  ;;  %v874_v1 = vmul.f32 0.5, %v2372_v63  ;;  %2107 = vmatprep.mubr.msk.f32.mxu0 %vm88_vm0, %v2560_v18 }
 0x308   :  { %2377 = vtanh.f32 %v2805_v62  ;;  %v873_v3 = vmul.f32 0.5, %v2374_v0 }
 0x309   :  { %v876_v4 = vadd.f32 0.5, %v874_v1 }
 0x30a   :  { %v875_v6 = vadd.f32 0.5, %v873_v3  ;;  %2108 = vmatmul.mubr.msk.f32.gmra.mrb[22].mxu0 %vm88_vm0, %v2572_v20 }
 0x30b   :  { %2114 = vmatprep.mubr.msk.f32.mxu0 %vm88_vm0, %v2580_v22 }
 0x311   :  { %v2376_v5 = vpop.eup %2375 }
 0x312   :  { %v2378_v49 = vpop.eup %2377  ;;  %v886_v8 = vmul.f32 %v2376_v5, %v876_v4 }
 0x313   :  { %v885_v10 = vmul.f32 %v2378_v49, %v875_v6 }
 0x315   :  { %v2193_v50 = vpack.c.bf16 %v886_v8, %v885_v10 }
 0x317   :  { %2194 = vmatprep.subr.bf16.mxu1 %v2193_v50 }
 0x318   :  { %2196 = vmatpush3.bf16.msra.mxu1 %v2193_v50 }
 0x31b   :  { %2083 = vmatmul.mubr.msk.f32.vlgmr.msra.gmra.mrb[8].mxu1 %vm88_vm0, %v2592_v24 }
 0x31c   :  { %2085 = vmatprep.mubr.msk.f32.mxu1 %vm88_vm0, %v2600_v26 }
 0x31f   :  { %2086 = vmatmul.mubr.msk.f32.gmra.mrb[10].mxu1 %vm88_vm0, %v2609_v27 }
 0x320   :  { %2088 = vmatprep.mubr.msk.f32.mxu1 %vm88_vm0, %v2614_v28 }
 0x323   :  { %2089 = vmatmul.mubr.msk.f32.gmra.mrb[12].mxu1 %vm88_vm0, %v2623_v29 }
 0x324   :  { %2091 = vmatprep.mubr.msk.f32.mxu1 %vm88_vm0, %v2628_v30 }
 0x327   :  { %2092 = vmatmul.mubr.msk.f32.gmra.mrb[14].mxu1 %vm88_vm0, %v2637_v31 }
 0x328   :  { %2130 = vmatprep.mubr.msk.f32.mxu1 %vm88_vm0, %v2497_v2 }
 0x3ee   :  { %v2084_v2 = vpop.f32.mrb[8].mxu1 }
 0x3ef   :  { %v2240_v17 = vadd.f32 %v2084_v2, %v2669_v37  ;;  %v1061_v19 = vpop.f32.mrb[9].mxu1 }
 0x3f0   :  { %v2241_v21 = vadd.f32 %v1061_v19, %v2665_v35 }
 0x3f1   :  { %2379 = vtanh.f32 %v2240_v17 }
 0x3f2   :  { %2381 = vtanh.f32 %v2241_v21  ;;  %v2087_v23 = vpop.f32.mrb[10].mxu1 }
 0x3f3   :  { %v2242_v33 = vadd.f32 %v2087_v23, %v2671_v39  ;;  %v1071_v34 = vpop.f32.mrb[11].mxu1 }
 0x3f4   :  { %v2243_v38 = vadd.f32 %v1071_v34, %v2667_v36  ;;  %v1824_v34 = vld [vmem:[%s2955_s0 + $0x50] sm:$0xff] }
 0x3f5   :  { %2383 = vtanh.f32 %v2242_v33 }
 0x3f6   :  { %2385 = vtanh.f32 %v2243_v38  ;;  %v2090_v40 = vpop.f32.mrb[12].mxu1  ;;  %v1825_v38 = vld [vmem:[%s2955_s0 + $0x58] sm:$0xff] }
 0x3f7   :  { %v2244_v41 = vadd.f32 %v2090_v40, %v2677_v47  ;;  %v1081_v42 = vpop.f32.mrb[13].mxu1  ;;  %v2205_v40 = vpack.c.bf16 %v1825_v38, %v1824_v34  ;;  %v2464_v38 = vmov 0.0|0.0  }
 0x3f8   :  { %v2245_v43 = vadd.f32 %v1081_v42, %v2679_v48 }
 0x3f9   :  { %2387 = vtanh.f32 %v2244_v41  ;;  %2206 = vmatprep.subr.bf16.mxu1 %v2205_v40 }
 0x3fa   :  { %2389 = vtanh.f32 %v2245_v43  ;;  %v2093_v44 = vpop.f32.mrb[14].mxu1  ;;  %2208 = vmatpush3.bf16.msra.mxu1 %v2205_v40 }
 0x3fb   :  { %v2380_v45 = vpop.eup %2379  ;;  %v1091_v46 = vpop.f32.mrb[15].mxu1  ;;  %v2246_v52 = vadd.f32 %v2093_v44, %v2683_v55 }
 0x3fc   :  { %v2382_v51 = vpop.eup %2381  ;;  %v2247_v53 = vadd.f32 %v1091_v46, %v2685_v58  ;;  %v1117_v54 = vmul.f32 0.5, %v2380_v45 }
 0x3fd   :  { %v1116_v57 = vmul.f32 0.5, %v2382_v51  ;;  %2391 = vtanh.f32 %v2246_v52  ;;  %2131 = vmatmul.mubr.msk.f32.vlgmr.msra.gmra.mrb[16].mxu1 %vm88_vm0, %v2512_v7 }
 0x3fe   :  { %2393 = vtanh.f32 %v2247_v53  ;;  %v1119_v61 = vadd.f32 0.5, %v1117_v54  ;;  %2133 = vmatprep.mubr.msk.f32.mxu1 %vm88_vm0, %v2517_v9 }
 0x3ff   :  { %v2384_v56 = vpop.eup %2383  ;;  %v1118_v1 = vadd.f32 0.5, %v1116_v57 }
 0x400   :  { %v2386_v59 = vpop.eup %2385  ;;  %v1121_v25 = vmul.f32 0.5, %v2384_v56 }
 0x401   :  { %v1120_v60 = vmul.f32 0.5, %v2386_v59  ;;  %2134 = vmatmul.mubr.msk.f32.gmra.mrb[18].mxu1 %vm88_vm0, %v2532_v12 }
 0x402   :  { %v1123_v63 = vadd.f32 0.5, %v1121_v25  ;;  %2136 = vmatprep.mubr.msk.f32.mxu1 %vm88_vm0, %v2540_v14 }
 0x403   :  { %v2388_v0 = vpop.eup %2387  ;;  %v1122_v3 = vadd.f32 0.5, %v1120_v60 }
 0x404   :  { %v2390_v4 = vpop.eup %2389  ;;  %v1129_v5 = vmul.f32 %v1123_v63, %v2803_v32  ;;  %v1131_v6 = vmul.f32 %v2388_v0, %v1119_v61 }
 0x405   :  { %v1128_v49 = vmul.f32 %v1122_v3, %v2805_v62  ;;  %v1130_v8 = vmul.f32 %v2390_v4, %v1118_v1  ;;  %2137 = vmatmul.mubr.msk.f32.gmra.mrb[20].mxu1 %vm88_vm0, %v2552_v16 }
 0x406   :  { %v2857_v10 = vadd.f32 %v1131_v6, %v1129_v5  ;;  %2139 = vmatprep.mubr.msk.f32.mxu1 %vm88_vm0, %v2560_v18 }
 0x407   :  { %v2859_v50 = vadd.f32 %v1130_v8, %v1128_v49  ;;  %v2392_v11 = vpop.eup %2391 }
 0x408   :  { %2395 = vtanh.f32 %v2857_v10  ;;  %v2394_v13 = vpop.eup %2393  ;;  %v1125_v15 = vmul.f32 0.5, %v2392_v11 }
 0x409   :  { %2397 = vtanh.f32 %v2859_v50  ;;  %v1124_v2 = vmul.f32 0.5, %v2394_v13  ;;  %2140 = vmatmul.mubr.msk.f32.gmra.mrb[22].mxu1 %vm88_vm0, %v2572_v20 }
 0x40a   :  { %v1127_v17 = vadd.f32 0.5, %v1125_v15  ;;  %2146 = vmatprep.mubr.msk.f32.mxu1 %vm88_vm0, %v2580_v22 }
 0x40b   :  { %v1126_v21 = vadd.f32 0.5, %v1124_v2 }
 0x412   :  { %v2396_v19 = vpop.eup %2395 }
 0x413   :  { %v2398_v32 = vpop.eup %2397  ;;  %v1137_v23 = vmul.f32 %v2396_v19, %v1127_v17 }
 0x414   :  { %v1136_v33 = vmul.f32 %v2398_v32, %v1126_v21 }
 0x416   :  { %v2201_v62 = vpack.c.bf16 %v1137_v23, %v1136_v33 }
 0x418   :  { %2202 = vmatprep.subr.bf16.mxu0 %v2201_v62 }
 0x419   :  { %2204 = vmatpush3.bf16.msra.mxu0 %v2201_v62 }
 0x41a   :  { %2213 = vmatprep.subr.bf16.mxu0 %v2464_v38 }
 0x41c   :  { %2115 = vmatmul.mubr.msk.f32.vlgmr.msra.gmra.mrb[16].mxu0 %vm88_vm0, %v2592_v24 }
 0x41d   :  { %2117 = vmatprep.mubr.msk.f32.mxu0 %vm88_vm0, %v2600_v26 }
 0x420   :  { %2118 = vmatmul.mubr.msk.f32.gmra.mrb[18].mxu0 %vm88_vm0, %v2609_v27 }
 0x421   :  { %2120 = vmatprep.mubr.msk.f32.mxu0 %vm88_vm0, %v2614_v28 }
 0x424   :  { %2121 = vmatmul.mubr.msk.f32.gmra.mrb[20].mxu0 %vm88_vm0, %v2623_v29 }
 0x425   :  { %2123 = vmatprep.mubr.msk.f32.mxu0 %vm88_vm0, %v2628_v30 }
 0x428   :  { %2124 = vmatmul.mubr.msk.f32.gmra.mrb[22].mxu0 %vm88_vm0, %v2637_v31 }
 0x4ef   :  { %v2116_v7 = vpop.f32.mrb[16].mxu0 }
 0x4f0   :  { %v2248_v9 = vadd.f32 %v2116_v7, %v2669_v37  ;;  %v1312_v41 = vpop.f32.mrb[17].mxu0 }
 0x4f1   :  { %v2249_v12 = vadd.f32 %v1312_v41, %v2665_v35 }
 0x4f2   :  { %2399 = vtanh.f32 %v2248_v9 }
 0x4f3   :  { %2401 = vtanh.f32 %v2249_v12  ;;  %v2119_v14 = vpop.f32.mrb[18].mxu0 }
 0x4f4   :  { %v2250_v16 = vadd.f32 %v2119_v14, %v2671_v39  ;;  %v1322_v42 = vpop.f32.mrb[19].mxu0 }
 0x4f5   :  { %v2251_v18 = vadd.f32 %v1322_v42, %v2667_v36 }
 0x4f6   :  { %2403 = vtanh.f32 %v2250_v16 }
 0x4f7   :  { %2405 = vtanh.f32 %v2251_v18  ;;  %v2122_v20 = vpop.f32.mrb[20].mxu0 }
 0x4f8   :  { %v2252_v43 = vadd.f32 %v2122_v20, %v2677_v47  ;;  %v1332_v22 = vpop.f32.mrb[21].mxu0 }
 0x4f9   :  { %v2253_v44 = vadd.f32 %v1332_v22, %v2679_v48 }
 0x4fa   :  { %2407 = vtanh.f32 %v2252_v43 }
 0x4fb   :  { %2409 = vtanh.f32 %v2253_v44  ;;  %v2125_v45 = vpop.f32.mrb[22].mxu0 }
 0x4fc   :  { %v2400_v46 = vpop.eup %2399  ;;  %v1342_v51 = vpop.f32.mrb[23].mxu0  ;;  %v2254_v53 = vadd.f32 %v2125_v45, %v2683_v55 }
 0x4fd   :  { %v2402_v52 = vpop.eup %2401  ;;  %v2255_v54 = vadd.f32 %v1342_v51, %v2685_v58  ;;  %v1368_v56 = vmul.f32 0.5, %v2400_v46 }
 0x4fe   :  { %v1367_v59 = vmul.f32 0.5, %v2402_v52  ;;  %2411 = vtanh.f32 %v2254_v53 }
 0x4ff   :  { %2413 = vtanh.f32 %v2255_v54  ;;  %v1370_v63 = vadd.f32 0.5, %v1368_v56 }
 0x500   :  { %v2404_v57 = vpop.eup %2403  ;;  %v1369_v3 = vadd.f32 0.5, %v1367_v59 }
 0x501   :  { %v2406_v25 = vpop.eup %2405  ;;  %v1372_v60 = vmul.f32 0.5, %v2404_v57 }
 0x502   :  { %v1371_v61 = vmul.f32 0.5, %v2406_v25 }
 0x503   :  { %v1374_v0 = vadd.f32 0.5, %v1372_v60 }
 0x504   :  { %v2408_v1 = vpop.eup %2407  ;;  %v1373_v4 = vadd.f32 0.5, %v1371_v61 }
 0x505   :  { %v2410_v5 = vpop.eup %2409  ;;  %v1380_v6 = vmul.f32 %v1374_v0, %v2857_v10  ;;  %v1382_v49 = vmul.f32 %v2408_v1, %v1370_v63 }
 0x506   :  { %v1379_v8 = vmul.f32 %v1373_v4, %v2859_v50  ;;  %v1381_v11 = vmul.f32 %v2410_v5, %v1369_v3 }
 0x507   :  { %v2909_v13 = vadd.f32 %v1382_v49, %v1380_v6 }
 0x508   :  { %v2911_v15 = vadd.f32 %v1381_v11, %v1379_v8  ;;  %v2412_v2 = vpop.eup %2411  ;;  %v39_v8 = vld [vmem:[%s2956_s1 + $0xc0] sm:$0xff]  ;;  %v1643_v11 = vpop.permute.xlu0 %1642 }
 0x509   :  { %2415 = vtanh.f32 %v2909_v13  ;;  %v2414_v17 = vpop.eup %2413  ;;  %v1376_v19 = vmul.f32 0.5, %v2412_v2 }
 0x50a   :  { %2417 = vtanh.f32 %v2911_v15  ;;  %v1375_v21 = vmul.f32 0.5, %v2414_v17 }
 0x50b   :  { %v1378_v32 = vadd.f32 0.5, %v1376_v19 }
 0x50c   :  { %v1377_v33 = vadd.f32 0.5, %v1375_v21 }
 0x513   :  { %v2416_v23 = vpop.eup %2415 }
 0x514   :  { %v2418_v10 = vpop.eup %2417  ;;  %v1388_v62 = vmul.f32 %v2416_v23, %v1378_v32 }
 0x515   :  { %v1387_v34 = vmul.f32 %v2418_v10, %v1377_v33 }
 0x517   :  { %v2209_v50 = vpack.c.bf16 %v1388_v62, %v1387_v34 }
 0x519   :  { %2210 = vmatprep.subr.bf16.mxu1 %v2209_v50 }
 0x51a   :  { %2212 = vmatpush3.bf16.msra.mxu1 %v2209_v50 }
 0x51d   :  { %2147 = vmatmul.mubr.msk.f32.vlgmr.msra.gmra.mrb[16].mxu1 %vm88_vm0, %v2592_v24  ;;  %v2466_v24 = vmov 0.0  }
 0x51e   :  { %2149 = vmatprep.mubr.msk.f32.mxu1 %vm88_vm0, %v2600_v26  ;;  %2162 = vmatprep.mubr.msk.f32.mxu0 %vm2465_vm1, %v2466_v24 }
 0x521   :  { %2150 = vmatmul.mubr.msk.f32.gmra.mrb[18].mxu1 %vm88_vm0, %v2609_v27 }
 0x522   :  { %2152 = vmatprep.mubr.msk.f32.mxu1 %vm88_vm0, %v2614_v28 }
 0x525   :  { %2153 = vmatmul.mubr.msk.f32.gmra.mrb[20].mxu1 %vm88_vm0, %v2623_v29 }
 0x526   :  { %2155 = vmatprep.mubr.msk.f32.mxu1 %vm88_vm0, %v2628_v30 }
 0x529   :  { %2156 = vmatmul.mubr.msk.f32.gmra.mrb[22].mxu1 %vm88_vm0, %v2637_v31 }
 0x5f0   :  { %v2148_v26 = vpop.f32.mrb[16].mxu1 }
 0x5f1   :  { %v2256_v27 = vadd.f32 %v2148_v26, %v2669_v37  ;;  %v1563_v40 = vpop.f32.mrb[17].mxu1 }
 0x5f2   :  { %v2257_v28 = vadd.f32 %v1563_v40, %v2665_v35 }
 0x5f3   :  { %2419 = vtanh.f32 %v2256_v27 }
 0x5f4   :  { %2421 = vtanh.f32 %v2257_v28  ;;  %v2151_v29 = vpop.f32.mrb[18].mxu1 }
 0x5f5   :  { %v2258_v7 = vadd.f32 %v2151_v29, %v2671_v39  ;;  %v1573_v30 = vpop.f32.mrb[19].mxu1 }
 0x5f6   :  { %v2259_v9 = vadd.f32 %v1573_v30, %v2667_v36 }
 0x5f7   :  { %2423 = vtanh.f32 %v2258_v7 }
 0x5f8   :  { %2425 = vtanh.f32 %v2259_v9  ;;  %v2154_v31 = vpop.f32.mrb[20].mxu1 }
 0x5f9   :  { %v2260_v41 = vadd.f32 %v2154_v31, %v2677_v47  ;;  %v1583_v12 = vpop.f32.mrb[21].mxu1 }
 0x5fa   :  { %v2261_v14 = vadd.f32 %v1583_v12, %v2679_v48 }
 0x5fb   :  { %2427 = vtanh.f32 %v2260_v41 }
 0x5fc   :  { %2429 = vtanh.f32 %v2261_v14  ;;  %v2157_v37 = vpop.f32.mrb[22].mxu1 }
 0x5fd   :  { %v2420_v35 = vpop.eup %2419  ;;  %v1593_v16 = vpop.f32.mrb[23].mxu1  ;;  %v2262_v18 = vadd.f32 %v2157_v37, %v2683_v55 }
 0x5fe   :  { %v2422_v42 = vpop.eup %2421  ;;  %v2263_v39 = vadd.f32 %v1593_v16, %v2685_v58  ;;  %v1619_v20 = vmul.f32 0.5, %v2420_v35 }
 0x5ff   :  { %v1618_v43 = vmul.f32 0.5, %v2422_v42  ;;  %2431 = vtanh.f32 %v2262_v18 }
 0x600   :  { %2433 = vtanh.f32 %v2263_v39  ;;  %v1621_v45 = vadd.f32 0.5, %v1619_v20 }
 0x601   :  { %v2424_v36 = vpop.eup %2423  ;;  %v1620_v51 = vadd.f32 0.5, %v1618_v43 }
 0x602   :  { %v2426_v22 = vpop.eup %2425  ;;  %v1623_v44 = vmul.f32 0.5, %v2424_v36 }
 0x603   :  { %v1622_v47 = vmul.f32 0.5, %v2426_v22 }
 0x604   :  { %v1625_v48 = vadd.f32 0.5, %v1623_v44 }
 0x605   :  { %v2428_v46 = vpop.eup %2427  ;;  %v1624_v52 = vadd.f32 0.5, %v1622_v47 }
 0x606   :  { %v2430_v53 = vpop.eup %2429  ;;  %v1631_v54 = vmul.f32 %v1625_v48, %v2909_v13  ;;  %v1633_v56 = vmul.f32 %v2428_v46, %v1621_v45 }
 0x607   :  { %v1630_v55 = vmul.f32 %v1624_v52, %v2911_v15  ;;  %v1632_v58 = vmul.f32 %v2430_v53, %v1620_v51 }
 0x608   :  { %v1635_v57 = vadd.f32 %v1633_v56, %v1631_v54 }
 0x609   :  { %v1634_v59 = vadd.f32 %v1632_v58, %v1630_v55  ;;  %v2432_v25 = vpop.eup %2431 }
 0x60a   :  { %2435 = vtanh.f32 %v1635_v57  ;;  %v2434_v60 = vpop.eup %2433  ;;  %v1627_v61 = vmul.f32 0.5, %v2432_v25 }
 0x60b   :  { %2437 = vtanh.f32 %v1634_v59  ;;  %v1626_v63 = vmul.f32 0.5, %v2434_v60 }
 0x60c   :  { %v1629_v0 = vadd.f32 0.5, %v1627_v61 }
 0x60d   :  { %v1628_v3 = vadd.f32 0.5, %v1626_v63 }
 0x614   :  { %v2436_v1 = vpop.eup %2435 }
 0x615   :  { %v2438_v4 = vpop.eup %2437  ;;  %v1639_v5 = vmul.f32 %v2436_v1, %v1629_v0 }
 0x616   :  { %v1638_v6 = vmul.f32 %v2438_v4, %v1628_v3 }
 0x618   :  { %v2214_v49 = vpack.c.bf16 %v1639_v5, %v1638_v6 }
 0x61a   :  { %2215 = vmatpush3.bf16.msra.mxu0 %v2214_v49 }
 0x61d   :  { %2163 = vmatmul.mubr.msk.f32.vlgmr.msra.gmra.mrb[24].mxu0 %vm88_vm0, %v39_v8 }
 0x6f0   :  { %v1714_v13 = vpop.f32.mrb[24].mxu0 }
 0x6f1   :  { %v1715_v15 = vadd.f32 %v1714_v13, %v1643_v11  ;;  %v2164_v2 = vpop.f32.mrb[25].mxu0 }
 0x6f3   :  { %1719 = vst.msk [vmem:[#allocation2] sm:$0xff] %vm1718_vm2, %v1715_v15 }
 0x6f4   :  { %2450 = shalt.err (!%p2447_p4)
}
 0x6f5   :  { %s2451_s17 = scalar_lea.hbm %s2958_s3, 128 }
 0x6f6   :  { %p2452_p5 = scmp.ne.s32.totalorder %s2958_s3, %s2451_s17  ;;  %p2455_p6 = scmp.lt.u32.totalorder %s2451_s17, %s2958_s3 }
 0x6f8   :  { %p2457_p7 = pnand %p2455_p6, %p2452_p5 }
 0x6fa   :  { %2460 = shalt.err (!%p2457_p7)
}
 0x6fb   :  { %1729 = dma.vmem_to_hbm [thread:$0]  %s1727_s14, 128, %s2958_s3, [#allocation3]  }
 0x6fc   :  { %2461 = dma.done.wait [#allocation3], 128  }
 0x6fd   :  { %2462 = vsyncadd [#allocation3], 4294967168 }
 0x6fe   :  { %1733 = vsyncpa [#allocation3], 1 }

</bundles_post_ra>
